<compile_context>
chip_gen: v7x
topology: tpu7x:2x2x1
jax: 0.10.0
libtpu: 0.0.40
codegen_flags: <defaults>
</compile_context>

<pallas_src>
import functools

import numpy as np
import jax
import jax.numpy as jnp
from jax.experimental import pallas as pl
from jax.experimental.pallas import tpu as pltpu


# ----------------------------------------------------------------------------
# Tiling / padding helpers
# ----------------------------------------------------------------------------
def _round_up(x, m):
    return ((x + m - 1) // m) * m


def _tile(dim, tile_max, align):
    """Padded dim and tile size: tile is a multiple of `align`, <= ~tile_max,
    and divides the padded dim with minimal padding."""
    dp = _round_up(dim, align)
    steps = -(-dp // tile_max)                    # ceil
    t = _round_up(-(-dp // steps), align)
    return t * steps, t


def _pick_div_tile(dim, tile_max, align):
    """Largest multiple of `align` that divides `dim` and is <= tile_max."""
    best = align
    t = align
    while t <= min(dim, tile_max):
        if dim % t == 0:
            best = t
        t += align
    return best


def _vmem_limit(block_bytes):
    """Computed scoped-VMEM request (double-buffering + slack), clamped so it
    stays safe on v7x's 64 MiB VMEM."""
    need = int(3 * block_bytes) + (4 << 20)
    return max(16 << 20, min(need, 32 << 20))


# ----------------------------------------------------------------------------
# Exact-GELU helper (erf via Abramowitz & Stegun 7.1.26, |err| <= 1.5e-7 -
# far below the bf16 quantization already applied to the MXU inputs).
# ----------------------------------------------------------------------------
def _erf_approx(x):
    p = 0.3275911
    a1, a2, a3, a4, a5 = (0.254829592, -0.284496736, 1.421413741,
                          -1.453152027, 1.061405429)
    z = jnp.abs(x)
    t = 1.0 / (1.0 + p * z)
    poly = ((((a5 * t + a4) * t + a3) * t + a2) * t + a1) * t
    e = 1.0 - poly * jnp.exp(-z * z)
    return jnp.where(x >= 0, e, -e)


def _gelu(x):
    return 0.5 * x * (1.0 + _erf_approx(x * 0.7071067811865476))


# ----------------------------------------------------------------------------
# General tiled matmul kernel: C = A @ B + bias (bias along N), optional GELU.
# Used for token embedding / projection / last Linear (all small K).
# ----------------------------------------------------------------------------
def _matmul_kernel(a_ref, b_ref, bias_ref, o_ref, acc_ref, *, activation):
    @pl.when(pl.program_id(2) == 0)
    def _():
        acc_ref[...] = jnp.zeros_like(acc_ref)

    acc_ref[...] += jnp.dot(a_ref[...], b_ref[...],
                            preferred_element_type=jnp.float32)

    @pl.when(pl.program_id(2) == pl.num_programs(2) - 1)
    def _():
        y = acc_ref[...] + bias_ref[...]
        if activation == "gelu":
            y = _gelu(y)
        o_ref[...] = y.astype(o_ref.dtype)


def pallas_matmul(a, b_p, bias_p, n_out, activation=None, out_dtype=jnp.float32,
                  tm_max=256, tn_max=512, tk_max=1024):
    """a:[M,K] any float; b_p:[Kp,Np] pre-padded bf16; bias_p:[1,Np] f32."""
    M, K = a.shape
    Kp0, Np0 = b_p.shape
    n_al = 256 if (Np0 % 256 == 0 and Np0 >= 256) else 128   # MXU-friendly
    k_al = 256 if (Kp0 % 256 == 0 and Kp0 >= 256) else 128
    Mp, tm = _tile(M, tm_max, 16)                             # 16: bf16 packing
    Np, tn = _tile(Np0, tn_max, n_al)
    Kp, tk = _tile(Kp0, tk_max, k_al)
    # give both v7x TensorCores at least one parallel tile when M allows
    if (Mp // tm) * (Np // tn) == 1 and Mp >= 32:
        tm = _round_up(Mp // 2, 16)
        Mp = 2 * tm

    a_p = jnp.pad(a.astype(jnp.bfloat16), ((0, Mp - M), (0, Kp - K)))
    if (Kp, Np) != (Kp0, Np0):
        b_p = jnp.pad(b_p, ((0, Kp - Kp0), (0, Np - Np0)))
        bias_p = jnp.pad(bias_p, ((0, 0), (0, Np - Np0)))

    blk_bytes = (tm * tk + tk * tn) * 2 + tm * tn * 8 + tn * 4
    out = pl.pallas_call(
        functools.partial(_matmul_kernel, activation=activation),
        out_shape=jax.ShapeDtypeStruct((Mp, Np), out_dtype),
        grid=(Mp // tm, Np // tn, Kp // tk),
        in_specs=[pl.BlockSpec((tm, tk), lambda i, j, k: (i, k)),
                  pl.BlockSpec((tk, tn), lambda i, j, k: (k, j)),
                  pl.BlockSpec((1, tn), lambda i, j, k: (0, j))],
        out_specs=pl.BlockSpec((tm, tn), lambda i, j, k: (i, j)),
        scratch_shapes=[pltpu.VMEM((tm, tn), jnp.float32)],
        compiler_params=pltpu.CompilerParams(
            dimension_semantics=("parallel", "parallel", "arbitrary"),
            vmem_limit_bytes=_vmem_limit(blk_bytes)),
    )(a_p, b_p, bias_p)
    return out[:M, :n_out]


# ----------------------------------------------------------------------------
# predict_linear along the time axis:  out[b] = W[T_out,T] @ enc[b] + rbias.
# Avoids transposing the encoder tensor (channels stay last throughout).
# ----------------------------------------------------------------------------
def _time_linear_kernel(w_ref, x_ref, rb_ref, o_ref):
    o_ref[...] = (jnp.dot(w_ref[...], x_ref[...],
                          preferred_element_type=jnp.float32)
                  + rb_ref[...]).astype(o_ref.dtype)


def pallas_time_linear(w_p, rbias, x, tn_max=512):
    """w_p:[T_out,T] bf16, rbias:[T_out,1] f32, x:[B,T,Np] -> [B,T_out,Np] f32."""
    B, T, Np = x.shape
    Tout = w_p.shape[0]
    tn = _pick_div_tile(Np, tn_max, 128)
    blk_bytes = Tout * T * 2 + T * tn * 2 + Tout * tn * 4 + Tout * 4
    return pl.pallas_call(
        _time_linear_kernel,
        out_shape=jax.ShapeDtypeStruct((B, Tout, Np), jnp.float32),
        grid=(B, Np // tn),
        in_specs=[pl.BlockSpec((Tout, T), lambda b, j: (0, 0)),
                  pl.BlockSpec((None, T, tn), lambda b, j: (b, 0, j)),
                  pl.BlockSpec((Tout, 1), lambda b, j: (0, 0))],
        out_specs=pl.BlockSpec((None, Tout, tn), lambda b, j: (b, 0, j)),
        compiler_params=pltpu.CompilerParams(
            dimension_semantics=("parallel", "parallel"),
            vmem_limit_bytes=_vmem_limit(blk_bytes)),
    )(w_p, x.astype(jnp.bfloat16), rbias)


# ----------------------------------------------------------------------------
# Inception_Block_V1 as in-kernel tap accumulation on the time-flat activation.
#   out[m, o] = bias[o] + sum_taps mask_dj(m) * sum_c x[m + di*W + dj, c] * w_tap[c, o]
# Halo rows of zeros handle the H (period-chunk) boundary; the per-dj mask
# handles the W (within-period) boundary.
# ----------------------------------------------------------------------------
def _conv_tap_kernel(x_ref, w_ref, b_ref, o_ref, *, taps, starts, W, L,
                     activation):
    to = o_ref.shape[-1]
    # per-dj row-validity masks (within-period / W boundary), built once
    w_idx = jax.lax.broadcasted_iota(jnp.int32, (L, 1), 0) % W
    masks = {}
    for (_, dj) in taps:
        if dj != 0 and dj not in masks:
            masks[dj] = (w_idx + dj >= 0) & (w_idx + dj < W)

    acc = jnp.zeros((L, to), jnp.float32)
    for t, (di, dj) in enumerate(taps):
        a = x_ref[starts[t]:starts[t] + L, :]                 # [L, Cp] bf16
        contrib = jnp.dot(a, w_ref[t], preferred_element_type=jnp.float32)
        if dj != 0:
            contrib = jnp.where(masks[dj], contrib, 0.0)
        acc = acc + contrib

    y = acc + b_ref[...]
    if activation == "gelu":
        y = _gelu(y)
    o_ref[...] = y.astype(o_ref.dtype)


def inception_conv(x_bf, t_real, length, W, wstack, bias, p_max, taps,
                   activation=None, out_dtype=jnp.bfloat16, to_max=256):
    """x_bf: [B, t_real, Cp] bf16 (channels zero-padded to a 128-multiple).
    Returns [B, length, Op] in `out_dtype` (length = padded time for period W).
    """
    B, _, Cp = x_bf.shape
    n_taps, Cw, Op = wstack.shape
    assert Cw == Cp
    halo = p_max * (W + 1)
    Lh = _round_up(halo + length + halo, 8)
    back = Lh - halo - t_real            # (length - t_real) zero fill + back halo
    x_h = jnp.pad(x_bf, ((0, 0), (halo, back), (0, 0)))       # single small pad
    starts = [halo + di * W + dj for (di, dj) in taps]

    to = _pick_div_tile(Op, to_max, 128)
    blk_bytes = Lh * Cp * 2 + n_taps * Cp * to * 2 + length * to * 6 + to * 4
    # TODO(synk): for very large num_kernels*d_ff (tap weights beyond VMEM)
    # add an 'arbitrary' tap-block grid axis with an accumulator scratch.
    return pl.pallas_call(
        functools.partial(_conv_tap_kernel, taps=taps, starts=starts,
                          W=W, L=length, activation=activation),
        out_shape=jax.ShapeDtypeStruct((B, length, Op), out_dtype),
        grid=(Op // to, B),          # weight tile stays resident across batch
        in_specs=[pl.BlockSpec((None, Lh, Cp), lambda oi, bi: (bi, 0, 0)),
                  pl.BlockSpec((n_taps, Cp, to), lambda oi, bi: (0, 0, oi)),
                  pl.BlockSpec((1, to), lambda oi, bi: (0, oi))],
        out_specs=pl.BlockSpec((None, length, to), lambda oi, bi: (bi, 0, oi)),
        compiler_params=pltpu.CompilerParams(
            dimension_semantics=("parallel", "parallel"),
            vmem_limit_bytes=_vmem_limit(blk_bytes)),
    )(x_h, wstack, bias)


# ----------------------------------------------------------------------------
# Fused (softmax-weighted period sum + residual add + masked LayerNorm).
# Residual branches are passed as k separate bf16 refs (no stack copy);
# statistics are f32 over the real d_model channels only.
# ----------------------------------------------------------------------------
def _combine_ln_kernel(*refs, k, n_real, eps):
    x_ref, pw_ref, g_ref, b_ref, m_ref = refs[:5]
    res_refs = refs[5:5 + k]
    o_ref = refs[5 + k]

    y = x_ref[...]
    pw = pw_ref[...]
    for i in range(k):
        y = y + pw[:, i:i + 1] * res_refs[i][...].astype(jnp.float32)
    msk = m_ref[...]
    inv_n = 1.0 / n_real
    mu = jnp.sum(y * msk, axis=-1, keepdims=True) * inv_n
    yc = y - mu
    var = jnp.sum(yc * yc * msk, axis=-1, keepdims=True) * inv_n   # biased (torch LN)
    o_ref[...] = yc * jax.lax.rsqrt(var + eps) * g_ref[...] + b_ref[...]


def combine_add_layernorm(res_list, period_weight, x, gamma_p, beta_p,
                          chan_mask, n_real, tm_max=512):
    """LayerNorm( x + sum_k softmax(pw)[:,k] * res_k )  over [B,T,Np]."""
    B, T, Np = x.shape
    k = len(res_list)
    M = B * T
    Mp, tm = _tile(M, tm_max, 8)
    if Mp // tm == 1 and Mp >= 16:       # >=2 parallel tiles for v7x megacore
        tm = _round_up(max(8, Mp // 2), 8)
        Mp = _round_up(M, tm)

    pw = jax.nn.softmax(period_weight.astype(jnp.float32), axis=1)       # [B,k]
    pw_rows = jnp.pad(jnp.broadcast_to(pw[:, None, :], (B, T, k)).reshape(M, k),
                      ((0, Mp - M), (0, 0)))
    x2 = jnp.pad(x.reshape(M, Np), ((0, Mp - M), (0, 0)))
    res_p = [jnp.pad(r.reshape(M, Np), ((0, Mp - M), (0, 0))) for r in res_list]

    in_specs = [pl.BlockSpec((tm, Np), lambda i: (i, 0)),
                pl.BlockSpec((tm, k), lambda i: (i, 0)),
                pl.BlockSpec((1, Np), lambda i: (0, 0)),
                pl.BlockSpec((1, Np), lambda i: (0, 0)),
                pl.BlockSpec((1, Np), lambda i: (0, 0))]
    in_specs += [pl.BlockSpec((tm, Np), lambda i: (i, 0)) for _ in range(k)]

    blk_bytes = tm * Np * 8 + tm * k * 4 + 3 * Np * 4 + k * tm * Np * 2
    out = pl.pallas_call(
        functools.partial(_combine_ln_kernel, k=k, n_real=float(n_real), eps=1e-5),
        out_shape=jax.ShapeDtypeStruct((Mp, Np), jnp.float32),
        grid=(Mp // tm,),
        in_specs=in_specs,
        out_specs=pl.BlockSpec((tm, Np), lambda i: (i, 0)),
        compiler_params=pltpu.CompilerParams(
            dimension_semantics=("parallel",),
            vmem_limit_bytes=_vmem_limit(blk_bytes)),
    )(x2, pw_rows, gamma_p, beta_p, chan_mask, *res_p)
    return out[:M].reshape(B, T, Np)


# ----------------------------------------------------------------------------
# Positional embedding (fixed, sin/cos)
# ----------------------------------------------------------------------------
def positional_embedding(T, d_model):
    position = jnp.arange(T, dtype=jnp.float32)[:, None]
    div_term = jnp.exp(jnp.arange(0, d_model, 2, dtype=jnp.float32)
                       * -(np.log(10000.0) / d_model))
    pe = jnp.zeros((T, d_model), jnp.float32)
    pe = pe.at[:, 0::2].set(jnp.sin(position * div_term))
    pe = pe.at[:, 1::2].set(jnp.cos(position * div_term))
    return pe


# ----------------------------------------------------------------------------
# TimesBlock / TimesNet forward
# ----------------------------------------------------------------------------
def times_block(enc, enc_bf, blk, top_k, n_real):
    """enc: [B,T,Np] f32 (channel-padded).  Returns k residual branches
    ([B,T,Np] bf16) and period_weight [B,k]."""
    B, T, _ = enc.shape
    # FFT_for_Period.
    # TODO(synk): data-dependent reshape shapes force one host round-trip per
    # TimesBlock for the top-k indices (the rfft itself stays on device).
    xf = jnp.fft.rfft(enc[..., :n_real], axis=1)
    amp = jnp.abs(xf)                                            # [B, F, N]
    freq = np.array(jax.device_get(jnp.mean(jnp.mean(amp, axis=0), axis=-1)))
    freq[0] = 0.0
    top_list = np.argsort(-freq, kind="stable")[:top_k]          # torch.topk desc
    top_list = np.maximum(top_list, 1)        # guard T // 0 (torch would crash)
    periods = (T // top_list).astype(np.int64)
    period_weight = jnp.mean(amp, axis=-1)[:, top_list]          # [B, k]

    res_list = []
    for i in range(top_k):
        p = int(periods[i])
        length = T if T % p == 0 else ((T // p) + 1) * p
        h1 = inception_conv(enc_bf, T, length, p, blk["w1"], blk["b1"],
                            blk["p_max"], blk["taps"], activation="gelu",
                            out_dtype=jnp.bfloat16)              # conv1 + GELU
        h2 = inception_conv(h1, length, length, p, blk["w2"], blk["b2"],
                            blk["p_max"], blk["taps"], activation=None,
                            out_dtype=jnp.bfloat16)              # conv2
        res_list.append(h2[:, :T, :])
    return res_list, period_weight


def timesnet_forward(x, prep, cfg):
    """Forecast-style TimesNet; returns [B, pred_len, c_out]."""
    B = x.shape[0]
    seq_len, pred_len = cfg["seq_len"], cfg["pred_len"]
    d_model, c_out = cfg["d_model"], cfg["c_out"]
    enc_in = cfg["enc_in"]
    T_out = seq_len + pred_len
    Np = prep["d_model_p"]

    # Non-stationary normalization
    means = jnp.mean(x, axis=1, keepdims=True)
    x0 = x - means
    stdev = jnp.sqrt(jnp.var(x0, axis=1, keepdims=True) + 1e-5)
    x0 = x0 / stdev

    # DataEmbedding: TokenEmbedding (Conv1d k=3, circular pad, no bias) + PE
    idx = (jnp.arange(seq_len)[:, None] + jnp.arange(-1, 2)[None, :]) % seq_len
    patches = x0[:, idx, :].reshape(B * seq_len, 3 * enc_in)
    tok = pallas_matmul(patches, prep["token_wmat"], prep["token_b"], n_out=Np)
    enc = tok.reshape(B, seq_len, Np) + prep["pos_emb"][None]    # [B, T, Np] f32

    # predict_linear over the time axis (batched W @ enc[b], no transposes)
    enc = pallas_time_linear(prep["pred_wmat"], prep["pred_rb"], enc)  # [B,T_out,Np]

    # e_layers x (TimesBlock -> fused weighted-sum + residual + LayerNorm)
    for l in range(cfg["e_layers"]):
        blk = prep["blocks"][l]
        enc_bf = enc.astype(jnp.bfloat16)
        res_list, pw = times_block(enc, enc_bf, blk, cfg["top_k"], d_model)
        enc = combine_add_layernorm(res_list, pw, enc, prep["ln_g"][l],
                                    prep["ln_b"][l], prep["chan_mask"], d_model)

    # projection + de-normalization
    dec = pallas_matmul(enc.reshape(B * T_out, Np), prep["proj_wmat"],
                        prep["proj_b"], n_out=c_out).reshape(B, T_out, c_out)
    dec = dec * stdev[:, 0:1, :] + means[:, 0:1, :]
    return dec[:, -pred_len:, :]


def model_forward(x, prep, cfg):
    """TIMESNET.forward: timesnet(x)[:, -pred_len:] -> last(.) -> [:, :, 0]."""
    out = timesnet_forward(x, prep, cfg)                         # [B, P, c_out]
    B, P, C = out.shape
    y = pallas_matmul(out.reshape(B * P, C), prep["last_wmat"], prep["last_b"],
                      n_out=prep["last_out"])
    return y.reshape(B, P, -1)[:, :, 0]                          # [B, P]


# ----------------------------------------------------------------------------
# Parameters: deterministic synthetic init + one-time relayout (all padding,
# transposes, bias averaging and bf16 casts are hoisted out of the hot path).
# ----------------------------------------------------------------------------
def init_params(key, cfg, last_out):
    d_model, d_ff = cfg["d_model"], cfg["d_ff"]
    enc_in, c_out = cfg["enc_in"], cfg["c_out"]
    seq_len, pred_len = cfg["seq_len"], cfg["pred_len"]
    T_out = seq_len + pred_len
    nk = cfg["num_kernels"]

    keys = iter(jax.random.split(key, 512))

    def rnd(shape, scale=0.1):
        return scale * jax.random.normal(next(keys), shape, jnp.float32)

    blocks = []
    for _ in range(cfg["e_layers"]):
        blocks.append(dict(
            conv1_w=[rnd((d_ff, d_model, 2 * i + 1, 2 * i + 1)) for i in range(nk)],
            conv1_b=[rnd((d_ff,), 0.01) for _ in range(nk)],
            conv2_w=[rnd((d_model, d_ff, 2 * i + 1, 2 * i + 1)) for i in range(nk)],
            conv2_b=[rnd((d_model,), 0.01) for _ in range(nk)],
        ))

    return dict(
        token_w=rnd((d_model, enc_in, 3)),                 # Conv1d weight, no bias
        pred_w=rnd((T_out, seq_len)), pred_b=rnd((T_out,), 0.01),
        blocks=blocks,
        ln_g=[jnp.ones((d_model,), jnp.float32) for _ in range(cfg["e_layers"])],
        ln_b=[jnp.zeros((d_model,), jnp.float32) for _ in range(cfg["e_layers"])],
        proj_w=rnd((c_out, d_model)), proj_b=rnd((c_out,), 0.01),
        last_w=rnd((last_out, c_out)), last_b=rnd((last_out,), 0.01),
    )


def prepare_params(params, cfg):
    nk = cfg["num_kernels"]
    d_model, d_ff = cfg["d_model"], cfg["d_ff"]
    enc_in, c_out = cfg["enc_in"], cfg["c_out"]
    seq_len, pred_len = cfg["seq_len"], cfg["pred_len"]
    T_out = seq_len + pred_len
    Np = _round_up(d_model, 128)
    Fp = _round_up(d_ff, 128)
    Cop = _round_up(c_out, 128)
    p_max = nk - 1

    # static tap list (di, dj) for all kernel sizes 1,3,...,2nk-1
    taps = []
    for i in range(nk):
        ksz = 2 * i + 1
        for u in range(ksz):
            for v in range(ksz):
                taps.append((u - i, v - i))

    def conv_stack(ws, bs, cin, cp, cout, op):
        mats = []
        for i, w in enumerate(ws):                         # w: [cout, cin, k, k]
            ksz = 2 * i + 1
            for u in range(ksz):
                for v in range(ksz):
                    mats.append(jnp.transpose(w[:, :, u, v]) / nk)   # [cin, cout]
        wst = jnp.stack(mats, 0)                                       # [n_taps, cin, cout]
        wst = jnp.pad(wst, ((0, 0), (0, cp - cin), (0, op - cout))).astype(jnp.bfloat16)
        bias = jnp.pad((sum(bs) / nk).astype(jnp.float32), (0, op - cout)).reshape(1, op)
        return wst, bias

    blocks = []
    for blk in params["blocks"]:
        w1, b1 = conv_stack(blk["conv1_w"], blk["conv1_b"], d_model, Np, d_ff, Fp)
        w2, b2 = conv_stack(blk["conv2_w"], blk["conv2_b"], d_ff, Fp, d_model, Np)
        blocks.append(dict(w1=w1, b1=b1, w2=w2, b2=b2, p_max=p_max, taps=taps))

    def pad_linear(w, b, kp, np_):
        wm = jnp.pad(jnp.transpose(w),
                     ((0, kp - w.shape[1]), (0, np_ - w.shape[0]))).astype(jnp.bfloat16)
        bb = jnp.pad(b.astype(jnp.float32), (0, np_ - b.shape[0])).reshape(1, np_)
        return wm, bb

    kt = _round_up(3 * enc_in, 128)
    token_wmat = jnp.pad(
        jnp.transpose(params["token_w"], (2, 1, 0)).reshape(3 * enc_in, d_model),
        ((0, kt - 3 * enc_in), (0, Np - d_model))).astype(jnp.bfloat16)
    token_b = jnp.zeros((1, Np), jnp.float32)

    pred_wmat = params["pred_w"].astype(jnp.bfloat16)                 # [T_out, seq]
    pred_rb = params["pred_b"].astype(jnp.float32).reshape(T_out, 1)

    proj_wmat, proj_b = pad_linear(params["proj_w"], params["proj_b"], Np, Cop)
    last_out = params["last_w"].shape[0]
    last_wmat, last_b = pad_linear(params["last_w"], params["last_b"],
                                   _round_up(c_out, 128), _round_up(last_out, 128))

    ln_g = [jnp.pad(g, (0, Np - d_model)).reshape(1, Np) for g in params["ln_g"]]
    ln_b = [jnp.pad(b, (0, Np - d_model)).reshape(1, Np) for b in params["ln_b"]]
    chan_mask = (jnp.arange(Np) < d_model).astype(jnp.float32).reshape(1, Np)
    pos_emb = jnp.pad(positional_embedding(seq_len, d_model),
                      ((0, 0), (0, Np - d_model)))

    return dict(token_wmat=token_wmat, token_b=token_b,
                pred_wmat=pred_wmat, pred_rb=pred_rb,
                proj_wmat=proj_wmat, proj_b=proj_b,
                last_wmat=last_wmat, last_b=last_b, last_out=last_out,
                ln_g=ln_g, ln_b=ln_b, chan_mask=chan_mask,
                pos_emb=pos_emb, blocks=blocks, d_model_p=Np)


# ----------------------------------------------------------------------------
if __name__ == "__main__":
    cfg = dict(seq_len=8, pred_len=4, enc_in=4, c_out=4,
               d_model=32, d_ff=32, e_layers=2, top_k=2, num_kernels=3,
               embed="fixed", freq="h", dropout=0.0)

    key = jax.random.PRNGKey(0)
    k_param, k_x = jax.random.split(key)
    # type_ = 'rainfall' -> last = nn.Linear(c_out, 12)
    params = init_params(k_param, cfg, last_out=12)
    prep = prepare_params(params, cfg)

    x = jax.random.normal(k_x, (2, cfg["seq_len"], cfg["enc_in"]), jnp.float32)

    y = model_forward(x, prep, cfg)                     # [B, pred_len]
    jax.block_until_ready(y)
    assert y.shape == (2, cfg["pred_len"])
    print("KERNEL_OK")
</pallas_src>

<mosaic_0001>
module attributes {stable_mosaic.version = 11 : i64} {
  func.func @_matmul_kernel(%arg0: i32, %arg1: i32, %arg2: i32, %arg3: memref<16x128xbf16, #tpu.memory_space<vmem>>, %arg4: memref<128x128xbf16, #tpu.memory_space<vmem>>, %arg5: memref<1x128xf32, #tpu.memory_space<vmem>>, %arg6: memref<16x128xf32, #tpu.memory_space<vmem>>, %arg7: memref<16x128xf32, #tpu.memory_space<vmem>>) attributes {dimension_semantics = [#tpu.dimension_semantics<parallel>, #tpu.dimension_semantics<parallel>, #tpu.dimension_semantics<arbitrary>], iteration_bounds = array<i64: 1, 1, 1>, scalar_prefetch = 0 : i64, scratch_operands = 1 : i64, tpu.core_type = #tpu.core_type<tc>, window_params = [{transform_indices = @transform_0, window_bounds = array<i64: 16, 128>}, {transform_indices = @transform_1, window_bounds = array<i64: 128, 128>}, {transform_indices = @transform_2, window_bounds = array<i64: 1, 128>}, {transform_indices = @transform_3, window_bounds = array<i64: 16, 128>}]} {
    %c0_i32 = arith.constant 0 : i32
    %0 = arith.cmpi eq, %arg2, %c0_i32 : i32
    %1 = arith.extui %0 : i1 to i32
    %c0_i32_0 = arith.constant 0 : i32
    %2 = arith.cmpi ne, %1, %c0_i32_0 : i32
    scf.if %2 {
      %cst_10 = arith.constant 0.000000e+00 : f32
      %12 = vector.broadcast %cst_10 : f32 to vector<16x128xf32>
      %c0_11 = arith.constant 0 : index
      %c0_12 = arith.constant 0 : index
      %13 = vector.load %arg7[%c0_11, %c0_12] : memref<16x128xf32, #tpu.memory_space<vmem>>, vector<16x128xf32>
      tpu.vector_store %arg7[%c0_11, %c0_12], %12 {strides = array<i32>} : memref<16x128xf32, #tpu.memory_space<vmem>>, vector<16x128xf32>,
    } else {
    }
    %c0 = arith.constant 0 : index
    %c0_1 = arith.constant 0 : index
    %3 = vector.load %arg7[%c0, %c0_1] : memref<16x128xf32, #tpu.memory_space<vmem>>, vector<16x128xf32>
    %c0_2 = arith.constant 0 : index
    %c0_3 = arith.constant 0 : index
    %4 = vector.load %arg3[%c0_2, %c0_3] : memref<16x128xbf16, #tpu.memory_space<vmem>>, vector<16x128xbf16>
    %c0_4 = arith.constant 0 : index
    %c0_5 = arith.constant 0 : index
    %5 = vector.load %arg4[%c0_4, %c0_5] : memref<128x128xbf16, #tpu.memory_space<vmem>>, vector<128x128xbf16>
    %cst = arith.constant dense<0.000000e+00> : vector<16x128xf32>
    %6 = tpu.matmul %4, %5, %cst {dimension_numbers = #tpu.dot_dimension_numbers<[1], [0], [0], [1], [0, 0, 1, 1], [], []>} : vector<16x128xbf16>, vector<128x128xbf16>, vector<16x128xf32> -> vector<16x128xf32>
    %7 = arith.addf %3, %6 : vector<16x128xf32>
    %c0_6 = arith.constant 0 : index
    %c0_7 = arith.constant 0 : index
    %8 = vector.load %arg7[%c0_6, %c0_7] : memref<16x128xf32, #tpu.memory_space<vmem>>, vector<16x128xf32>
    tpu.vector_store %arg7[%c0_6, %c0_7], %7 {strides = array<i32>} : memref<16x128xf32, #tpu.memory_space<vmem>>, vector<16x128xf32>,
    %c0_i32_8 = arith.constant 0 : i32
    %9 = arith.cmpi eq, %arg2, %c0_i32_8 : i32
    %10 = arith.extui %9 : i1 to i32
    %c0_i32_9 = arith.constant 0 : i32
    %11 = arith.cmpi ne, %10, %c0_i32_9 : i32
    scf.if %11 {
      %c0_10 = arith.constant 0 : index
      %c0_11 = arith.constant 0 : index
      %12 = vector.load %arg7[%c0_10, %c0_11] : memref<16x128xf32, #tpu.memory_space<vmem>>, vector<16x128xf32>
      %c0_12 = arith.constant 0 : index
      %c0_13 = arith.constant 0 : index
      %13 = vector.load %arg5[%c0_12, %c0_13] : memref<1x128xf32, #tpu.memory_space<vmem>>, vector<1x128xf32>
      %14 = vector.broadcast %13 : vector<1x128xf32> to vector<16x128xf32>
      %15 = arith.addf %12, %14 : vector<16x128xf32>
      %c0_14 = arith.constant 0 : index
      %c0_15 = arith.constant 0 : index
      %16 = vector.load %arg6[%c0_14, %c0_15] : memref<16x128xf32, #tpu.memory_space<vmem>>, vector<16x128xf32>
      tpu.vector_store %arg6[%c0_14, %c0_15], %15 {strides = array<i32>} : memref<16x128xf32, #tpu.memory_space<vmem>>, vector<16x128xf32>,
    } else {
    }
    return
  }
  func.func @transform_0(%arg0: i32, %arg1: i32, %arg2: i32) -> (i32, i32) {
    %c0_i32 = arith.constant 0 : i32
    return %arg0, %arg2 : i32, i32
  }
  func.func @transform_1(%arg0: i32, %arg1: i32, %arg2: i32) -> (i32, i32) {
    %c0_i32 = arith.constant 0 : i32
    return %arg2, %arg1 : i32, i32
  }
  func.func @transform_2(%arg0: i32, %arg1: i32, %arg2: i32) -> (i32, i32) {
    %c0_i32 = arith.constant 0 : i32
    %c0_i32_0 = arith.constant 0 : i32
    return %c0_i32, %arg1 : i32, i32
  }
  func.func @transform_3(%arg0: i32, %arg1: i32, %arg2: i32) -> (i32, i32) {
    %c0_i32 = arith.constant 0 : i32
    return %arg0, %arg1 : i32, i32
  }
}

</mosaic_0001>

<bundles_post_ra>
// kernel: tpu_custom_call.1
= control target key start
LH: loop header
LB: loop body
LE: loop exit
PB: predicated region body
PF: predicated region fallthrough
CT: control target
= control target key end

     0   :  { %8 = vsyncpa [#allocation4], 0  ;;  %s400_s0 = inlined_call_operand.hbm [shape: bf16[16,128], index: 0, kind: input, shape index: {}]   ;;  %s401_s1 = inlined_call_operand.hbm [shape: bf16[128,128], index: 1, kind: input, shape index: {}]   ;;  %s402_s2 = inlined_call_operand.vmem [shape: f32[1,128], index: 2, kind: input, shape index: {}]   ;;  %s403_s3 = inlined_call_operand.hbm [shape: f32[16,128], index: 3, kind: output, shape index: {}]  }
   0x1   :  { %9 = vsyncpa [#allocation7], 0 }
   0x2   :  { %10 = vsyncpa [#allocation5], 0  ;;  %s332_s12 = smov [#allocation3]   ;;  %s260_s16 = scalar_lea.hbm %s400_s0, 128 }
   0x3   :  { %s16_s13 = sshll.u32 %s332_s12, 4  ;;  %p261_p0 = scmp.ne.s32.totalorder %s400_s0, %s260_s16  ;;  %s17_s13 = int_to_ptr.vmem [resolvable:$true] %s16_s13 }
   0x4   :  { %p264_p1 = scmp.lt.u32.totalorder %s260_s16, %s400_s0 }
   0x6   :  { %p266_p2 = pnand %p264_p1, %p261_p0 }
   0x8   :  { %269 = shalt.err (!%p266_p2)
}
   0x9   :  { %s270_s21 = scalar_lea.vmem %s17_s13, 128  ;;  %p275_p4 = scmp.lt.s32.totalorder %s17_s13, %s17_s13 }
   0xa   :  { %p271_p3 = scmp.ne.s32.totalorder %s17_s13, %s270_s21  ;;  %p276_p5 = scmp.lt.s32.totalorder %s270_s21, %s270_s21 }
   0xc   :  { %p277_p6 = por %p276_p5, %p275_p4 }
   0xe   :  { %p278_p7 = pnand %p277_p6, %p271_p3 }
  0x10   :  { %281 = shalt.err (!%p278_p7)
}
  0x11   :  { %s333_s22 = smov 64   ;;  %s334_s23 = smov 4  }
  0x12   :  { %22 = dma.hbm_to_vmem [thread:$0]  %s400_s0, 128, %s17_s13, [#allocation4], %s333_s22, %s333_s22, %s334_s23  }
  0x13   :  { %s335_s26 = smov [#allocation6]   ;;  %s282_s30 = scalar_lea.hbm %s401_s1, 1024 }
  0x14   :  { %s28_s27 = sshll.u32 %s335_s26, 4  ;;  %p283_p8 = scmp.ne.s32.totalorder %s401_s1, %s282_s30  ;;  %s29_s27 = int_to_ptr.vmem [resolvable:$true] %s28_s27 }
  0x15   :  { %p286_p9 = scmp.lt.u32.totalorder %s282_s30, %s401_s1 }
  0x17   :  { %p288_p10 = pnand %p286_p9, %p283_p8 }
  0x19   :  { %291 = shalt.err (!%p288_p10)
}
  0x1a   :  { %s292_s8 = scalar_lea.vmem %s29_s27, 1024  ;;  %p297_p12 = scmp.lt.s32.totalorder %s29_s27, %s29_s27 }
  0x1b   :  { %p293_p11 = scmp.ne.s32.totalorder %s29_s27, %s292_s8  ;;  %p298_p13 = scmp.lt.s32.totalorder %s292_s8, %s292_s8 }
  0x1d   :  { %p299_p0 = por %p298_p13, %p297_p12 }
  0x1f   :  { %p300_p1 = pnand %p299_p0, %p293_p11 }
  0x21   :  { %303 = shalt.err (!%p300_p1)
}
  0x22   :  { %34 = dma.hbm_to_vmem [thread:$0]  %s401_s1, 1024, %s29_s27, [#allocation7], %s333_s22, %s333_s22, %s334_s23  }
  0x23   :  { %326 = dma.done.wait [#allocation4], 128  }
  0x24   :  { %327 = vsyncadd [#allocation4], 4294967168 }
  0x25   :  { %328 = dma.done.wait [#allocation7], 1024  }
  0x26   :  { %329 = vsyncadd [#allocation7], 4294966272  ;;  %v336_v0 = vmov 0.0   ;;  %vm337_vm0 = vmmov 0   ;;  %v251_v1 = vld [vmem:[#allocation6] sm:$0xff]   ;;  %v252_v2 = vld [vmem:[#allocation6 + $0x8] sm:$0xff]  }
  0x27   :  { %222 = vmatprep.subr.bf16.mxu0 %v336_v0  ;;  %238 = vmatprep.mubr.msk.bf16.mxu0 %vm337_vm0, %v336_v0  ;;  %v253_v3 = vld [vmem:[#allocation6 + $0x10] sm:$0xff]   ;;  %v254_v4 = vld [vmem:[#allocation6 + $0x18] sm:$0xff]   ;;  %v255_v5 = vld [vmem:[#allocation6 + $0x20] sm:$0xff]   ;;  %s338_s11 = smov [#allocation8]  }
  0x28   :  { %223 = vmatpush3.bf16.msra.mxu0 %v251_v1  ;;  %v256_v6 = vld [vmem:[#allocation6 + $0x28] sm:$0xff]   ;;  %v257_v7 = vld [vmem:[#allocation6 + $0x30] sm:$0xff]   ;;  %v258_v8 = vld [vmem:[#allocation6 + $0x38] sm:$0xff]   ;;  %s190_s12 = sshll.u32 %s338_s11, 4  ;;  %s191_s12 = int_to_ptr.vmem [resolvable:$true] %s190_s12 }
  0x29   :  { %224 = vmatprep.subr.bf16.mxu0 %v336_v0  ;;  %v259_v9 = vld [vmem:[#allocation3] sm:$0xff]   ;;  %s304_s13 = scalar_lea.vmem %s191_s12, 256  ;;  %p309_p3 = scmp.lt.s32.totalorder %s191_s12, %s191_s12 }
  0x2a   :  { %v212_v10 = vld [vmem:[%s402_s2] ss:$0 sm:$0xff]  ;;  %p305_p2 = scmp.ne.s32.totalorder %s191_s12, %s304_s13  ;;  %p310_p4 = scmp.lt.s32.totalorder %s304_s13, %s304_s13 }
  0x2c   :  { %225 = vmatpush3.bf16.msra.mxu0 %v252_v2  ;;  %p311_p5 = por %p310_p4, %p309_p3 }
  0x2d   :  { %226 = vmatprep.subr.bf16.mxu0 %v336_v0 }
  0x2e   :  { %p312_p6 = pnand %p311_p5, %p305_p2 }
  0x30   :  { %227 = vmatpush3.bf16.msra.mxu0 %v253_v3 }
  0x31   :  { %228 = vmatprep.subr.bf16.mxu0 %v336_v0 }
  0x34   :  { %229 = vmatpush3.bf16.msra.mxu0 %v254_v4 }
  0x35   :  { %230 = vmatprep.subr.bf16.mxu0 %v336_v0 }
  0x38   :  { %231 = vmatpush3.bf16.msra.mxu0 %v255_v5 }
  0x39   :  { %232 = vmatprep.subr.bf16.mxu0 %v336_v0 }
  0x3c   :  { %233 = vmatpush3.bf16.msra.mxu0 %v256_v6 }
  0x3d   :  { %234 = vmatprep.subr.bf16.mxu0 %v336_v0 }
  0x40   :  { %235 = vmatpush3.bf16.msra.mxu0 %v257_v7 }
  0x41   :  { %236 = vmatprep.subr.bf16.mxu0 %v336_v0 }
  0x44   :  { %237 = vmatpush3.bf16.msra.mxu0 %v258_v8 }
  0x47   :  { %239 = vmatmul.mubr.bf16.vlgmr.msra.gmra.mrb[0].mxu0 %v259_v9 }
 0x11a   :  { %v158_v11 = vpop.f32.mrb[0].mxu0 }
 0x11b   :  { %v181_v12 = vadd.f32 %v212_v10, %v158_v11  ;;  %v240_v13 = vpop.f32.mrb[1].mxu0 }
 0x11c   :  { %v161_v14 = vpop.f32.mrb[2].mxu0 }
 0x11d   :  { %183 = vst [vmem:[#allocation8] sm:$0xff] %v181_v12  ;;  %v182_v15 = vadd.f32 %v212_v10, %v161_v14  ;;  %v241_v16 = vpop.f32.mrb[3].mxu0 }
 0x11f   :  { %184 = vst [vmem:[#allocation8 + $0x8] sm:$0xff] %v182_v15 }
 0x120   :  { %315 = shalt.err (!%p312_p6)
}
 0x121   :  { %s316_s15 = scalar_lea.hbm %s403_s3, 256 }
 0x122   :  { %p317_p7 = scmp.ne.s32.totalorder %s403_s3, %s316_s15  ;;  %p320_p8 = scmp.lt.u32.totalorder %s316_s15, %s403_s3 }
 0x124   :  { %p322_p9 = pnand %p320_p8, %p317_p7 }
 0x126   :  { %325 = shalt.err (!%p322_p9)
}
 0x127   :  { %s339_s20 = smov 128   ;;  %s340_s21 = smov 8  }
 0x128   :  { %196 = dma.vmem_to_hbm [thread:$0]  %s191_s12, 256, %s403_s3, [#allocation5], %s339_s20, %s339_s20, %s340_s21  }
 0x129   :  { %330 = dma.done.wait [#allocation5], 256  }
 0x12a   :  { %331 = vsyncadd [#allocation5], 4294967040 }
 0x12b   :  { %200 = vsyncpa [#allocation4], 1 }
 0x12c   :  { %201 = vsyncpa [#allocation7], 1 }
 0x12d   :  { %202 = vsyncpa [#allocation5], 1 }

</bundles_post_ra>
